<compile_context>
chip_gen: v7x
topology: tpu7x:2x2x1
jax: 0.10.0
libtpu: 0.0.40
codegen_flags: <defaults>
</compile_context>

<pallas_src>
import jax
import jax.numpy as jnp
from jax.experimental import pallas as pl
from jax.experimental.pallas import tpu as pltpu

N_STATES = 4      # env.observation_space.shape[0]  (CartPole)
N_ACTIONS = 2     # env.action_space.n              (CartPole)
HIDDEN = 50

LANE = 128        # lane width: hidden/output dims padded to this
SUBLANE = 8       # sublane granularity
SMALL_B = 512     # <= this: single grid step, lane-dense output
TILE_B = 512      # row-tile for the large-batch grid path


def _round_up(n, m):
    return ((n + m - 1) // m) * m


def _net_kernel(x_ref, w1_ref, b1_ref, w2_ref, b2_ref, o_ref):
    # x_ref : (tile_b, N_STATES)   f32
    # w1_ref: (N_STATES, LANE)     f32  (zero-padded cols >= HIDDEN)
    # b1_ref: (1, LANE)            f32  (zero-padded)
    # w2_ref: (LANE, LANE)         f32  (zero-padded rows >= HIDDEN, cols >= N_ACTIONS)
    # b2_ref: (1, LANE)            f32  (zero-padded)
    # o_ref : (tile_b, LANE) lane-dense store (small path)
    #      or (tile_b, N_ACTIONS) narrow masked store (large-B path)
    x = x_ref[...]
    rows = x.shape[0]

    # ---- fc1 on the VPU: unrolled over K = N_STATES (=4) FMAs,
    #      accumulator initialized with the (broadcast) bias.
    h = jnp.broadcast_to(b1_ref[...], (rows, LANE))
    for k in range(N_STATES):                        # static unroll, K = 4
        h = h + x[:, k:k + 1] * w1_ref[k:k + 1, :]   # (rows,1)*(1,LANE)
    h = jnp.maximum(h, 0.0)                          # ReLU

    # ---- output layer: dense 128x128 tile on the MXU, f32 accumulation.
    av = jnp.dot(h, w2_ref[...], preferred_element_type=jnp.float32)
    av = av + b2_ref[...]

    out_w = o_ref.shape[-1]
    if out_w == LANE:            # small path: unmasked lane-dense store
        o_ref[...] = av
    else:                        # large-B path: only the useful columns
        o_ref[...] = av[:, :out_w]


def pad_params(w1, b1, w2, b2):
    """Pad logical params to the kernel's lane-dense layout.

    Call ONCE at init / after each optimizer step — NOT per forward."""
    w1_pad = jnp.zeros((N_STATES, LANE), jnp.float32).at[:, :HIDDEN].set(
        jnp.asarray(w1, jnp.float32))
    b1_pad = jnp.zeros((1, LANE), jnp.float32).at[:, :HIDDEN].set(
        jnp.asarray(b1, jnp.float32).reshape(1, HIDDEN))
    w2_pad = jnp.zeros((LANE, LANE), jnp.float32).at[:HIDDEN, :N_ACTIONS].set(
        jnp.asarray(w2, jnp.float32))
    b2_pad = jnp.zeros((1, LANE), jnp.float32).at[:, :N_ACTIONS].set(
        jnp.asarray(b2, jnp.float32).reshape(1, N_ACTIONS))
    return w1_pad, b1_pad, w2_pad, b2_pad


def net_forward(x, w1_pad, b1_pad, w2_pad, b2_pad):
    """x: (B, N_STATES) f32; *_pad: pre-padded params from pad_params().
    Returns (B, N_ACTIONS) f32."""
    B = x.shape[0]
    x = x.astype(jnp.float32)

    if B <= SMALL_B:
        # Action-selection / small replay batches: one grid step, lane-dense
        # output (fixed per-op overhead dominates; no masked stores).
        tile_b = _round_up(max(B, 1), SUBLANE)
        b_pad = tile_b
        out_w = LANE
    else:
        # Replay-buffer batches: stream 512-row tiles; weights stay resident.
        tile_b = TILE_B
        b_pad = _round_up(B, tile_b)
        out_w = N_ACTIONS          # 64x less HBM writeback; masked vst is OK here

    if b_pad != B:                  # B is static under jit -> pad only if needed
        x = jnp.pad(x, ((0, b_pad - B), (0, 0)))

    grid = (b_pad // tile_b,)

    # Advisory cost of the *logical* work (not the padded shapes).
    flops = 2 * B * N_STATES * HIDDEN + 2 * B * HIDDEN * N_ACTIONS
    bytes_accessed = 4 * (B * N_STATES + N_STATES * HIDDEN + HIDDEN
                          + HIDDEN * N_ACTIONS + N_ACTIONS + B * N_ACTIONS)

    out = pl.pallas_call(
        _net_kernel,
        out_shape=jax.ShapeDtypeStruct((b_pad, out_w), jnp.float32),
        grid=grid,
        in_specs=[
            pl.BlockSpec((tile_b, N_STATES), lambda i: (i, 0)),   # x tiles stream
            pl.BlockSpec((N_STATES, LANE), lambda i: (0, 0)),     # resident
            pl.BlockSpec((1, LANE), lambda i: (0, 0)),            # resident
            pl.BlockSpec((LANE, LANE), lambda i: (0, 0)),         # resident (64 KiB)
            pl.BlockSpec((1, LANE), lambda i: (0, 0)),            # resident
        ],
        out_specs=pl.BlockSpec((tile_b, out_w), lambda i: (i, 0)),
        cost_estimate=pl.CostEstimate(
            flops=flops, transcendentals=0, bytes_accessed=bytes_accessed),
        compiler_params=pltpu.CompilerParams(
            dimension_semantics=("parallel",),      # shard row tiles on v7x's 2 TCs
            vmem_limit_bytes=4 * 1024 * 1024),      # per-tile footprint << this
    )(x, w1_pad, b1_pad, w2_pad, b2_pad)

    if out_w == LANE:
        out = out[:, :N_ACTIONS]
    if b_pad != B:
        out = out[:B]
    return out


def init_params(key):
    """Deterministic synthetic init matching the PyTorch module's shapes.

    PyTorch stores Linear weight as (out, in); we generate it that way (so the
    normal(0, 0.1) init matches semantically) and transpose for the kernel.
    Biases use PyTorch's default uniform(-1/sqrt(fan_in), +1/sqrt(fan_in))."""
    k1, k2, k3, k4 = jax.random.split(key, 4)
    w1_pt = 0.1 * jax.random.normal(k1, (HIDDEN, N_STATES), jnp.float32)      # fc1.weight
    w2_pt = 0.1 * jax.random.normal(k2, (N_ACTIONS, HIDDEN), jnp.float32)     # out.weight
    bound1 = 1.0 / jnp.sqrt(jnp.float32(N_STATES))
    bound2 = 1.0 / jnp.sqrt(jnp.float32(HIDDEN))
    b1 = jax.random.uniform(k3, (1, HIDDEN), jnp.float32, -bound1, bound1)    # fc1.bias
    b2 = jax.random.uniform(k4, (1, N_ACTIONS), jnp.float32, -bound2, bound2)  # out.bias
    return w1_pt.T, b1, w2_pt.T, b2


if __name__ == "__main__":
    key = jax.random.PRNGKey(0)
    kx, kp, kx2 = jax.random.split(key, 3)

    # Logical params + one-time padding (hoisted out of the forward path).
    w1, b1, w2, b2 = init_params(kp)
    padded = pad_params(w1, b1, w2, b2)

    fwd = jax.jit(net_forward)

    # ---- small action-selection batch (the canonical DQN path)
    B = 2
    x = jax.random.normal(kx, (B, N_STATES), jnp.float32)
    actions_value = jax.block_until_ready(fwd(x, *padded))
    ref = jnp.maximum(x @ w1 + b1, 0.0) @ w2 + b2
    assert actions_value.shape == (B, N_ACTIONS)
    assert jnp.allclose(actions_value, ref, atol=1e-5, rtol=1e-5)

    # ---- replay-buffer-sized batch (exercises the B-grid + narrow writeback)
    B2 = 1000  # not a tile multiple -> also exercises the row pad/slice
    x2 = jax.random.normal(kx2, (B2, N_STATES), jnp.float32)
    av2 = jax.block_until_ready(fwd(x2, *padded))
    ref2 = jnp.maximum(x2 @ w1 + b1, 0.0) @ w2 + b2
    assert av2.shape == (B2, N_ACTIONS)
    assert jnp.allclose(av2, ref2, atol=1e-4, rtol=1e-4)

    print("KERNEL_OK")
</pallas_src>

<mosaic_0001>
module attributes {stable_mosaic.version = 11 : i64} {
  func.func @_net_kernel(%arg0: i32, %arg1: memref<8x4xf32, #tpu.memory_space<vmem>>, %arg2: memref<4x128xf32, #tpu.memory_space<vmem>>, %arg3: memref<1x128xf32, #tpu.memory_space<vmem>>, %arg4: memref<128x128xf32, #tpu.memory_space<vmem>>, %arg5: memref<1x128xf32, #tpu.memory_space<vmem>>, %arg6: memref<8x128xf32, #tpu.memory_space<vmem>>) attributes {dimension_semantics = [#tpu.dimension_semantics<parallel>], iteration_bounds = array<i64: 1>, scalar_prefetch = 0 : i64, scratch_operands = 0 : i64, tpu.core_type = #tpu.core_type<tc>, window_params = [{transform_indices = @transform_0, window_bounds = array<i64: 8, 4>}, {pipeline_mode = #tpu.pipeline_mode<synchronous>, transform_indices = @transform_1, window_bounds = array<i64: 4, 128>}, {pipeline_mode = #tpu.pipeline_mode<synchronous>, transform_indices = @transform_2, window_bounds = array<i64: 1, 128>}, {pipeline_mode = #tpu.pipeline_mode<synchronous>, transform_indices = @transform_3, window_bounds = array<i64: 128, 128>}, {pipeline_mode = #tpu.pipeline_mode<synchronous>, transform_indices = @transform_4, window_bounds = array<i64: 1, 128>}, {transform_indices = @transform_5, window_bounds = array<i64: 8, 128>}]} {
    %c0 = arith.constant 0 : index
    %c0_0 = arith.constant 0 : index
    %0 = vector.load %arg1[%c0, %c0_0] : memref<8x4xf32, #tpu.memory_space<vmem>>, vector<8x4xf32>
    %c0_1 = arith.constant 0 : index
    %c0_2 = arith.constant 0 : index
    %1 = vector.load %arg3[%c0_1, %c0_2] : memref<1x128xf32, #tpu.memory_space<vmem>>, vector<1x128xf32>
    %2 = vector.shape_cast %1 : vector<1x128xf32> to vector<1x128xf32>
    %3 = vector.broadcast %2 : vector<1x128xf32> to vector<8x128xf32>
    %4 = vector.extract_strided_slice %0 {offsets = [0, 0], sizes = [8, 1], strides = [1, 1]} : vector<8x4xf32> to vector<8x1xf32>
    %c0_3 = arith.constant 0 : index
    %c0_4 = arith.constant 0 : index
    %5 = vector.load %arg2[%c0_3, %c0_4] : memref<4x128xf32, #tpu.memory_space<vmem>>, vector<1x128xf32>
    %6 = vector.broadcast %4 : vector<8x1xf32> to vector<8x128xf32>
    %7 = vector.broadcast %5 : vector<1x128xf32> to vector<8x128xf32>
    %8 = arith.mulf %6, %7 : vector<8x128xf32>
    %9 = arith.addf %3, %8 : vector<8x128xf32>
    %10 = vector.extract_strided_slice %0 {offsets = [0, 1], sizes = [8, 1], strides = [1, 1]} : vector<8x4xf32> to vector<8x1xf32>
    %c1 = arith.constant 1 : index
    %c0_5 = arith.constant 0 : index
    %11 = vector.load %arg2[%c1, %c0_5] : memref<4x128xf32, #tpu.memory_space<vmem>>, vector<1x128xf32>
    %12 = vector.broadcast %10 : vector<8x1xf32> to vector<8x128xf32>
    %13 = vector.broadcast %11 : vector<1x128xf32> to vector<8x128xf32>
    %14 = arith.mulf %12, %13 : vector<8x128xf32>
    %15 = arith.addf %9, %14 : vector<8x128xf32>
    %16 = vector.extract_strided_slice %0 {offsets = [0, 2], sizes = [8, 1], strides = [1, 1]} : vector<8x4xf32> to vector<8x1xf32>
    %c2 = arith.constant 2 : index
    %c0_6 = arith.constant 0 : index
    %17 = vector.load %arg2[%c2, %c0_6] : memref<4x128xf32, #tpu.memory_space<vmem>>, vector<1x128xf32>
    %18 = vector.broadcast %16 : vector<8x1xf32> to vector<8x128xf32>
    %19 = vector.broadcast %17 : vector<1x128xf32> to vector<8x128xf32>
    %20 = arith.mulf %18, %19 : vector<8x128xf32>
    %21 = arith.addf %15, %20 : vector<8x128xf32>
    %22 = vector.extract_strided_slice %0 {offsets = [0, 3], sizes = [8, 1], strides = [1, 1]} : vector<8x4xf32> to vector<8x1xf32>
    %c3 = arith.constant 3 : index
    %c0_7 = arith.constant 0 : index
    %23 = vector.load %arg2[%c3, %c0_7] : memref<4x128xf32, #tpu.memory_space<vmem>>, vector<1x128xf32>
    %24 = vector.broadcast %22 : vector<8x1xf32> to vector<8x128xf32>
    %25 = vector.broadcast %23 : vector<1x128xf32> to vector<8x128xf32>
    %26 = arith.mulf %24, %25 : vector<8x128xf32>
    %27 = arith.addf %21, %26 : vector<8x128xf32>
    %cst = arith.constant 0.000000e+00 : f32
    %28 = vector.broadcast %cst : f32 to vector<8x128xf32>
    %29 = arith.maximumf %27, %28 : vector<8x128xf32>
    %c0_8 = arith.constant 0 : index
    %c0_9 = arith.constant 0 : index
    %30 = vector.load %arg4[%c0_8, %c0_9] : memref<128x128xf32, #tpu.memory_space<vmem>>, vector<128x128xf32>
    %cst_10 = arith.constant dense<0.000000e+00> : vector<8x128xf32>
    %31 = tpu.matmul %29, %30, %cst_10 {dimension_numbers = #tpu.dot_dimension_numbers<[1], [0], [0], [1], [0, 0, 1, 1], [], []>} : vector<8x128xf32>, vector<128x128xf32>, vector<8x128xf32> -> vector<8x128xf32>
    %c0_11 = arith.constant 0 : index
    %c0_12 = arith.constant 0 : index
    %32 = vector.load %arg5[%c0_11, %c0_12] : memref<1x128xf32, #tpu.memory_space<vmem>>, vector<1x128xf32>
    %33 = vector.broadcast %32 : vector<1x128xf32> to vector<8x128xf32>
    %34 = arith.addf %31, %33 : vector<8x128xf32>
    %c0_13 = arith.constant 0 : index
    %c0_14 = arith.constant 0 : index
    %35 = vector.load %arg6[%c0_13, %c0_14] : memref<8x128xf32, #tpu.memory_space<vmem>>, vector<8x128xf32>
    tpu.vector_store %arg6[%c0_13, %c0_14], %34 {strides = array<i32>} : memref<8x128xf32, #tpu.memory_space<vmem>>, vector<8x128xf32>,
    return
  }
  func.func @transform_0(%arg0: i32) -> (i32, i32) {
    %c0_i32 = arith.constant 0 : i32
    %c0_i32_0 = arith.constant 0 : i32
    return %arg0, %c0_i32 : i32, i32
  }
  func.func @transform_1(%arg0: i32) -> (i32, i32) {
    %c0_i32 = arith.constant 0 : i32
    %c0_i32_0 = arith.constant 0 : i32
    %c0_i32_1 = arith.constant 0 : i32
    return %c0_i32, %c0_i32_0 : i32, i32
  }
  func.func @transform_2(%arg0: i32) -> (i32, i32) {
    %c0_i32 = arith.constant 0 : i32
    %c0_i32_0 = arith.constant 0 : i32
    %c0_i32_1 = arith.constant 0 : i32
    return %c0_i32, %c0_i32_0 : i32, i32
  }
  func.func @transform_3(%arg0: i32) -> (i32, i32) {
    %c0_i32 = arith.constant 0 : i32
    %c0_i32_0 = arith.constant 0 : i32
    %c0_i32_1 = arith.constant 0 : i32
    return %c0_i32, %c0_i32_0 : i32, i32
  }
  func.func @transform_4(%arg0: i32) -> (i32, i32) {
    %c0_i32 = arith.constant 0 : i32
    %c0_i32_0 = arith.constant 0 : i32
    %c0_i32_1 = arith.constant 0 : i32
    return %c0_i32, %c0_i32_0 : i32, i32
  }
  func.func @transform_5(%arg0: i32) -> (i32, i32) {
    %c0_i32 = arith.constant 0 : i32
    %c0_i32_0 = arith.constant 0 : i32
    return %arg0, %c0_i32 : i32, i32
  }
}

</mosaic_0001>

<bundles_post_ra>
// kernel: net_forward.1
= control target key start
LH: loop header
LB: loop body
LE: loop exit
PB: predicated region body
PF: predicated region fallthrough
CT: control target
= control target key end

     0   :  { %10 = vsyncpa [#allocation3], 0  ;;  %s308_s18 = smov [#allocation2]   ;;  %s384_s0 = inlined_call_operand.vmem [shape: f32[8,4], index: 0, kind: input, shape index: {}]   ;;  %s385_s1 = inlined_call_operand.vmem [shape: f32[4,128], index: 1, kind: input, shape index: {}]   ;;  %s386_s2 = inlined_call_operand.vmem [shape: f32[1,128], index: 2, kind: input, shape index: {}]   ;;  %s387_s3 = inlined_call_operand.hbm [shape: f32[128,128], index: 3, kind: input, shape index: {}]   ;;  %s388_s4 = inlined_call_operand.vmem [shape: f32[1,128], index: 4, kind: input, shape index: {}]   ;;  %s389_s5 = inlined_call_operand.vmem [shape: f32[8,128], index: 5, kind: output, shape index: {}]  }
   0x1   :  { %s22_s19 = sshll.u32 %s308_s18, 4  ;;  %s284_s22 = scalar_lea.hbm %s387_s3, 2048  ;;  %s23_s19 = int_to_ptr.vmem [resolvable:$true] %s22_s19 }
   0x2   :  { %p285_p0 = scmp.ne.s32.totalorder %s387_s3, %s284_s22  ;;  %p288_p1 = scmp.lt.u32.totalorder %s284_s22, %s387_s3 }
   0x4   :  { %p290_p2 = pnand %p288_p1, %p285_p0 }
   0x6   :  { %293 = shalt.err (!%p290_p2)
}
   0x7   :  { %s294_s27 = scalar_lea.vmem %s23_s19, 2048  ;;  %p299_p4 = scmp.lt.s32.totalorder %s23_s19, %s23_s19 }
   0x8   :  { %p295_p3 = scmp.ne.s32.totalorder %s23_s19, %s294_s27  ;;  %p300_p5 = scmp.lt.s32.totalorder %s294_s27, %s294_s27 }
   0xa   :  { %p301_p6 = por %p300_p5, %p299_p4 }
   0xc   :  { %p302_p7 = pnand %p301_p6, %p295_p3 }
   0xe   :  { %305 = shalt.err (!%p302_p7)
}
   0xf   :  { %s309_s28 = smov 128   ;;  %s310_s29 = smov 8  }
  0x10   :  { %28 = dma.hbm_to_vmem [thread:$0]  %s387_s3, 2048, %s23_s19, [#allocation3], %s309_s28, %s309_s28, %s310_s29  }
  0x11   :  { %306 = dma.done.wait [#allocation3], 2048  }
  0x12   :  { %307 = vsyncadd [#allocation3], 4294965248  ;;  %v311_v0 = vmov 0   ;;  %v312_v1 = vmov 2   ;;  %v313_v2 = vmov 0.0|0.0   ;;  %v34_v3 = vld [vmem:[%s384_s0] sm:$0xff] }
  0x13   :  { %279 = vset.pattern.permute.xlu0 %v311_v0  ;;  %281 = vset.pattern.permute.xlu1 %v312_v1  ;;  %v88_v4 = vld [vmem:[#allocation2] sm:$0xff]  ;;  %v89_v5 = vld [vmem:[#allocation2 + $0x8] sm:$0xff]  ;;  %v90_v7 = vld [vmem:[#allocation2 + $0x10] sm:$0xff]  ;;  %v314_v12 = vmov 1   ;;  %v315_v13 = vmov 3   ;;  %vm316_vm0 = vmmov 0  }
  0x14   :  { %245 = vmatprep.subr.bf16.mxu0 %v313_v2  ;;  %45 = vperm.xlu0 %279, %v34_v3   ;;  %v246_v6 = vpack.c.bf16 %v89_v5, %v88_v4  ;;  %v91_v8 = vld [vmem:[#allocation2 + $0x18] sm:$0xff]  ;;  %v92_v10 = vld [vmem:[#allocation2 + $0x20] sm:$0xff]  ;;  %v93_v11 = vld [vmem:[#allocation2 + $0x28] sm:$0xff]  ;;  %v317_v21 = vmov 0.0  }
  0x15   :  { %67 = vperm.xlu1 %281, %v34_v3   ;;  %v249_v9 = vpack.c.bf16 %v91_v8, %v90_v7  ;;  %v252_v14 = vpack.c.bf16 %v93_v11, %v92_v10  ;;  %v94_v15 = vld [vmem:[#allocation2 + $0x30] sm:$0xff]  ;;  %v95_v16 = vld [vmem:[#allocation2 + $0x38] sm:$0xff]  ;;  %v96_v18 = vld [vmem:[#allocation2 + $0x40] sm:$0xff]  ;;  %242 = vmatprep.mubr.msk.f32.mxu0 %vm316_vm0, %v317_v21 }
  0x16   :  { %247 = vmatpush3.bf16.msra.mxu0 %v246_v6  ;;  %v255_v17 = vpack.c.bf16 %v95_v16, %v94_v15  ;;  %v97_v19 = vld [vmem:[#allocation2 + $0x48] sm:$0xff]  ;;  %v98_v22 = vld [vmem:[#allocation2 + $0x50] sm:$0xff]  ;;  %v99_v23 = vld [vmem:[#allocation2 + $0x58] sm:$0xff] }
  0x17   :  { %248 = vmatprep.subr.bf16.mxu0 %v313_v2  ;;  %v258_v20 = vpack.c.bf16 %v97_v19, %v96_v18  ;;  %v261_v24 = vpack.c.bf16 %v99_v23, %v98_v22  ;;  %v100_v25 = vld [vmem:[#allocation2 + $0x60] sm:$0xff]  ;;  %v101_v26 = vld [vmem:[#allocation2 + $0x68] sm:$0xff]  ;;  %v102_v28 = vld [vmem:[#allocation2 + $0x70] sm:$0xff] }
  0x18   :  { %280 = vset.pattern.permute.xlu0 %v314_v12  ;;  %v264_v27 = vpack.c.bf16 %v101_v26, %v100_v25  ;;  %v103_v29 = vld [vmem:[#allocation2 + $0x78] sm:$0xff]  ;;  %v188_v31 = vld [vmem:[%s385_s1] ss:$0 sm:$0xff]  ;;  %v189_v36 = vld [vmem:[%s385_s1 + $0x1] ss:$0 sm:$0xff] }
  0x19   :  { %282 = vset.pattern.permute.xlu1 %v315_v13  ;;  %56 = vperm.xlu0 %280, %v34_v3   ;;  %v267_v30 = vpack.c.bf16 %v103_v29, %v102_v28  ;;  %v187_v35 = vld [vmem:[%s386_s2] ss:$0 sm:$0xff]  ;;  %v190_v37 = vld [vmem:[%s385_s1 + $0x2] ss:$0 sm:$0xff]  ;;  %v191_v39 = vld [vmem:[%s385_s1 + $0x3] ss:$0 sm:$0xff] }
  0x1a   :  { %78 = vperm.xlu1 %282, %v34_v3   ;;  %250 = vmatpush3.bf16.msra.mxu0 %v249_v9  ;;  %v192_v49 = vld [vmem:[%s388_s4] ss:$0 sm:$0xff] }
  0x1b   :  { %251 = vmatprep.subr.bf16.mxu0 %v313_v2 }
  0x1d   :  { %283 = vset.pattern.permute.xlu0 %v315_v13 }
  0x1e   :  { %253 = vmatpush3.bf16.msra.mxu0 %v252_v14 }
  0x1f   :  { %254 = vmatprep.subr.bf16.mxu0 %v313_v2 }
  0x22   :  { %256 = vmatpush3.bf16.msra.mxu0 %v255_v17 }
  0x23   :  { %257 = vmatprep.subr.bf16.mxu0 %v313_v2 }
  0x26   :  { %259 = vmatpush3.bf16.msra.mxu0 %v258_v20 }
  0x27   :  { %260 = vmatprep.subr.bf16.mxu0 %v313_v2 }
  0x2a   :  { %262 = vmatpush3.bf16.msra.mxu0 %v261_v24 }
  0x2b   :  { %263 = vmatprep.subr.bf16.mxu0 %v313_v2 }
  0x2e   :  { %265 = vmatpush3.bf16.msra.mxu0 %v264_v27 }
  0x2f   :  { %266 = vmatprep.subr.bf16.mxu0 %v313_v2 }
  0x32   :  { %268 = vmatpush3.bf16.msra.mxu0 %v267_v30 }
  0x93   :  { %v46_v32 = vpop.permute.xlu0 %45 }
  0x94   :  { %v68_v33 = vpop.permute.xlu1 %67  ;;  %v52_v34 = vmul.f32 %v188_v31, %v46_v32 }
  0x95   :  { %v74_v43 = vmul.f32 %v190_v37, %v68_v33 }
  0x96   :  { %v53_v41 = vadd.f32 %v187_v35, %v52_v34 }
  0x98   :  { %v57_v38 = vpop.permute.xlu0 %56 }
  0x99   :  { %v79_v40 = vpop.permute.xlu1 %78  ;;  %v63_v42 = vmul.f32 %v189_v36, %v57_v38 }
  0x9a   :  { %v85_v45 = vmul.f32 %v191_v39, %v79_v40 }
  0x9b   :  { %v64_v44 = vadd.f32 %v63_v42, %v53_v41 }
  0x9d   :  { %v75_v46 = vadd.f32 %v74_v43, %v64_v44 }
  0x9f   :  { %v86_v47 = vadd.f32 %v85_v45, %v75_v46 }
  0xa1   :  { %v87_v48 = vmax.f32 %v86_v47, 0.0 }
  0xa3   :  { %243 = vmatmul.mubr.f32.vlgmr.msra.gmra.mrb[0].mxu0 %v87_v48 }
 0x176   :  { %v177_v50 = vpop.f32.mrb[0].mxu0 }
 0x177   :  { %v178_v51 = vadd.f32 %v192_v49, %v177_v50  ;;  %v244_v52 = vpop.f32.mrb[1].mxu0 }
 0x179   :  { %181 = vst [vmem:[%s389_s5] sm:$0xff] %v178_v51 }
 0x17a   :  { %186 = vsyncpa [#allocation3], 1 }

</bundles_post_ra>
